<compile_context>
chip_gen: v6e
topology: v6e:2x2x1
jax: 0.10.0
libtpu: 0.0.40
codegen_flags: <defaults>
</compile_context>

<pallas_src>
import functools
import math

import jax
import jax.numpy as jnp
from jax.experimental import pallas as pl
from jax.experimental.pallas import tpu as pltpu


def _round_up(n, m):
    return ((n + m - 1) // m) * m


def _ddpg_kernel(x_ref, w1_ref, b1_ref, w2_ref, b2_ref, w3_ref, b3_ref,
                 o_ref, *, negative_slope, max_action):
    # Layer 1: Linear (bf16 operands, f32 accumulation) + LeakyReLU in f32.
    h = jnp.dot(x_ref[...], w1_ref[...], preferred_element_type=jnp.float32)
    h = h + b1_ref[...]
    h = jnp.where(h > 0, h, negative_slope * h)

    # Layer 2: Linear + LeakyReLU.
    h = jnp.dot(h.astype(w2_ref.dtype), w2_ref[...],
                preferred_element_type=jnp.float32)
    h = h + b2_ref[...]
    h = jnp.where(h > 0, h, negative_slope * h)

    # Layer 3: Linear + Tanh (EUP, f32), then scale by max_action.
    h = jnp.dot(h.astype(w3_ref.dtype), w3_ref[...],
                preferred_element_type=jnp.float32)
    h = h + b3_ref[...]
    o_ref[...] = (jnp.tanh(h) * max_action).astype(o_ref.dtype)


def ddpg_policy_forward(x, params, *, max_action, negative_slope=0.01):
    """x: [B, dim_state] float32. params: dict of w1,b1,w2,b2,w3,b3 (see init)."""
    B, dim_state = x.shape
    H = params["w1"].shape[1]
    dim_action = params["w3"].shape[1]

    # --- lane-pad the final layer to a multiple of 128 (lane-dense output) ---
    out_pad = _round_up(dim_action, 128)
    w3 = params["w3"].astype(jnp.bfloat16)
    b3 = params["b3"].astype(jnp.float32)
    if out_pad != dim_action:
        w3 = jnp.pad(w3, ((0, 0), (0, out_pad - dim_action)))
        b3 = jnp.pad(b3, ((0, 0), (0, out_pad - dim_action)))

    # --- batch tile: pad B to a sublane-friendly multiple, tile at <=512 rows ---
    b_pad = _round_up(B, 16)          # bf16 sublane packing = 16 rows
    tb = min(b_pad, 512)              # ~85% of HBM roofline territory; tiny VMEM
    b_pad = _round_up(b_pad, tb)

    x_bf16 = x.astype(jnp.bfloat16)
    if b_pad != B:
        x_bf16 = jnp.pad(x_bf16, ((0, b_pad - B), (0, 0)))

    w1 = params["w1"].astype(jnp.bfloat16)
    w2 = params["w2"].astype(jnp.bfloat16)
    b1 = params["b1"].astype(jnp.float32)
    b2 = params["b2"].astype(jnp.float32)

    kernel = functools.partial(
        _ddpg_kernel,
        negative_slope=negative_slope,
        max_action=max_action,
    )

    grid = (pl.cdiv(b_pad, tb),)

    # Weights / biases: constant block index -> stay VMEM-resident across the
    # batch grid (no re-DMA per step). x / out: tiled and double-buffered.
    resident = lambda shape: pl.BlockSpec(shape, lambda i: (0, 0))
    in_specs = [
        pl.BlockSpec((tb, dim_state), lambda i: (i, 0)),   # x
        resident((dim_state, H)),                          # w1
        resident((1, H)),                                  # b1
        resident((H, H)),                                  # w2
        resident((1, H)),                                  # b2
        resident((H, out_pad)),                            # w3 (lane-padded)
        resident((1, out_pad)),                            # b3 (lane-padded)
    ]
    out_specs = pl.BlockSpec((tb, out_pad), lambda i: (i, 0))

    flops = 2 * b_pad * (dim_state * H + H * H + H * out_pad)
    bytes_accessed = (
        b_pad * dim_state * 2                         # x (bf16)
        + (dim_state * H + H * H + H * out_pad) * 2   # weights (bf16)
        + (2 * H + out_pad) * 4                       # biases (f32)
        + b_pad * out_pad * 4                         # output (f32)
    )
    cost = pl.CostEstimate(
        flops=flops,
        transcendentals=b_pad * out_pad,              # tanh
        bytes_accessed=bytes_accessed,
    )

    out_padded = pl.pallas_call(
        kernel,
        out_shape=jax.ShapeDtypeStruct((b_pad, out_pad), jnp.float32),
        grid=grid,
        in_specs=in_specs,
        out_specs=out_specs,
        compiler_params=pltpu.CompilerParams(
            dimension_semantics=("parallel",),        # shards across TCs on v7x
            vmem_limit_bytes=32 * 1024 * 1024,        # well under v7x's 64 MiB
        ),
        cost_estimate=cost,
    )(x_bf16, w1, b1, w2, b2, w3, b3)

    return out_padded[:B, :dim_action]


def init_ddpg_params(key, dim_state, dim_action, dim_hidden=128):
    """Xavier-normal weights, zero biases (matches PyTorch init_weight)."""
    k1, k2, k3 = jax.random.split(key, 3)

    def xavier_normal(k, fan_in, fan_out):
        std = math.sqrt(2.0 / (fan_in + fan_out))
        # Stored as [in, out] so the kernel computes x @ W.
        return (std * jax.random.normal(k, (fan_in, fan_out))).astype(jnp.float32)

    return {
        "w1": xavier_normal(k1, dim_state, dim_hidden),
        "b1": jnp.zeros((1, dim_hidden), jnp.float32),
        "w2": xavier_normal(k2, dim_hidden, dim_hidden),
        "b2": jnp.zeros((1, dim_hidden), jnp.float32),
        "w3": xavier_normal(k3, dim_hidden, dim_action),
        "b3": jnp.zeros((1, dim_action), jnp.float32),
    }


if __name__ == "__main__":
    dim_state = 16
    dim_action = 8
    dim_hidden = 128
    max_action = 2.0
    batch = 8

    key = jax.random.PRNGKey(0)
    kx, kp = jax.random.split(key)

    x = jax.random.normal(kx, (batch, dim_state), dtype=jnp.float32)
    params = init_ddpg_params(kp, dim_state, dim_action, dim_hidden)

    out = ddpg_policy_forward(x, params, max_action=max_action)
    jax.block_until_ready(out)

    # Pure-JAX f32 reference of the same forward semantics.
    def ref(x, p):
        h = x @ p["w1"] + p["b1"]
        h = jnp.where(h > 0, h, 0.01 * h)
        h = h @ p["w2"] + p["b2"]
        h = jnp.where(h > 0, h, 0.01 * h)
        h = h @ p["w3"] + p["b3"]
        return jnp.tanh(h) * max_action

    expected = ref(x, params)
    assert out.shape == (batch, dim_action)
    # Kernel uses bf16 matmul operands (f32 accumulation), so compare against
    # the f32 reference with a bf16-appropriate tolerance.
    assert jnp.allclose(out, expected, atol=3e-2, rtol=3e-2), (
        jnp.max(jnp.abs(out - expected)))

    print("KERNEL_OK")
</pallas_src>

<mosaic_0001>
module attributes {stable_mosaic.version = 11 : i64} {
  func.func @_ddpg_kernel(%arg0: i32, %arg1: memref<16x16xbf16, #tpu.memory_space<vmem>>, %arg2: memref<16x128xbf16, #tpu.memory_space<vmem>>, %arg3: memref<1x128xf32, #tpu.memory_space<vmem>>, %arg4: memref<128x128xbf16, #tpu.memory_space<vmem>>, %arg5: memref<1x128xf32, #tpu.memory_space<vmem>>, %arg6: memref<128x128xbf16, #tpu.memory_space<vmem>>, %arg7: memref<1x128xf32, #tpu.memory_space<vmem>>, %arg8: memref<16x128xf32, #tpu.memory_space<vmem>>) attributes {dimension_semantics = [#tpu.dimension_semantics<parallel>], iteration_bounds = array<i64: 1>, scalar_prefetch = 0 : i64, scratch_operands = 0 : i64, tpu.core_type = #tpu.core_type<tc>, window_params = [{transform_indices = @transform_0, window_bounds = array<i64: 16, 16>}, {pipeline_mode = #tpu.pipeline_mode<synchronous>, transform_indices = @transform_1, window_bounds = array<i64: 16, 128>}, {pipeline_mode = #tpu.pipeline_mode<synchronous>, transform_indices = @transform_2, window_bounds = array<i64: 1, 128>}, {pipeline_mode = #tpu.pipeline_mode<synchronous>, transform_indices = @transform_3, window_bounds = array<i64: 128, 128>}, {pipeline_mode = #tpu.pipeline_mode<synchronous>, transform_indices = @transform_4, window_bounds = array<i64: 1, 128>}, {pipeline_mode = #tpu.pipeline_mode<synchronous>, transform_indices = @transform_5, window_bounds = array<i64: 128, 128>}, {pipeline_mode = #tpu.pipeline_mode<synchronous>, transform_indices = @transform_6, window_bounds = array<i64: 1, 128>}, {transform_indices = @transform_7, window_bounds = array<i64: 16, 128>}]} {
    %c0 = arith.constant 0 : index
    %c0_0 = arith.constant 0 : index
    %0 = vector.load %arg1[%c0, %c0_0] : memref<16x16xbf16, #tpu.memory_space<vmem>>, vector<16x16xbf16>
    %c0_1 = arith.constant 0 : index
    %c0_2 = arith.constant 0 : index
    %1 = vector.load %arg2[%c0_1, %c0_2] : memref<16x128xbf16, #tpu.memory_space<vmem>>, vector<16x128xbf16>
    %cst = arith.constant dense<0.000000e+00> : vector<16x128xf32>
    %2 = tpu.matmul %0, %1, %cst {dimension_numbers = #tpu.dot_dimension_numbers<[1], [0], [0], [1], [0, 0, 1, 1], [], []>} : vector<16x16xbf16>, vector<16x128xbf16>, vector<16x128xf32> -> vector<16x128xf32>
    %c0_3 = arith.constant 0 : index
    %c0_4 = arith.constant 0 : index
    %3 = vector.load %arg3[%c0_3, %c0_4] : memref<1x128xf32, #tpu.memory_space<vmem>>, vector<1x128xf32>
    %4 = vector.broadcast %3 : vector<1x128xf32> to vector<16x128xf32>
    %5 = arith.addf %2, %4 : vector<16x128xf32>
    %cst_5 = arith.constant 0.000000e+00 : f32
    %6 = vector.broadcast %cst_5 : f32 to vector<16x128xf32>
    %7 = arith.cmpf ogt, %5, %6 : vector<16x128xf32>
    %cst_6 = arith.constant 0.00999999977 : f32
    %8 = vector.broadcast %cst_6 : f32 to vector<16x128xf32>
    %9 = arith.mulf %8, %5 : vector<16x128xf32>
    %10 = arith.select %7, %5, %9 : vector<16x128xi1>, vector<16x128xf32>
    %11 = arith.truncf %10 : vector<16x128xf32> to vector<16x128xbf16>
    %c0_7 = arith.constant 0 : index
    %c0_8 = arith.constant 0 : index
    %12 = vector.load %arg4[%c0_7, %c0_8] : memref<128x128xbf16, #tpu.memory_space<vmem>>, vector<128x128xbf16>
    %cst_9 = arith.constant dense<0.000000e+00> : vector<16x128xf32>
    %13 = tpu.matmul %11, %12, %cst_9 {dimension_numbers = #tpu.dot_dimension_numbers<[1], [0], [0], [1], [0, 0, 1, 1], [], []>} : vector<16x128xbf16>, vector<128x128xbf16>, vector<16x128xf32> -> vector<16x128xf32>
    %c0_10 = arith.constant 0 : index
    %c0_11 = arith.constant 0 : index
    %14 = vector.load %arg5[%c0_10, %c0_11] : memref<1x128xf32, #tpu.memory_space<vmem>>, vector<1x128xf32>
    %15 = vector.broadcast %14 : vector<1x128xf32> to vector<16x128xf32>
    %16 = arith.addf %13, %15 : vector<16x128xf32>
    %cst_12 = arith.constant 0.000000e+00 : f32
    %17 = vector.broadcast %cst_12 : f32 to vector<16x128xf32>
    %18 = arith.cmpf ogt, %16, %17 : vector<16x128xf32>
    %cst_13 = arith.constant 0.00999999977 : f32
    %19 = vector.broadcast %cst_13 : f32 to vector<16x128xf32>
    %20 = arith.mulf %19, %16 : vector<16x128xf32>
    %21 = arith.select %18, %16, %20 : vector<16x128xi1>, vector<16x128xf32>
    %22 = arith.truncf %21 : vector<16x128xf32> to vector<16x128xbf16>
    %c0_14 = arith.constant 0 : index
    %c0_15 = arith.constant 0 : index
    %23 = vector.load %arg6[%c0_14, %c0_15] : memref<128x128xbf16, #tpu.memory_space<vmem>>, vector<128x128xbf16>
    %cst_16 = arith.constant dense<0.000000e+00> : vector<16x128xf32>
    %24 = tpu.matmul %22, %23, %cst_16 {dimension_numbers = #tpu.dot_dimension_numbers<[1], [0], [0], [1], [0, 0, 1, 1], [], []>} : vector<16x128xbf16>, vector<128x128xbf16>, vector<16x128xf32> -> vector<16x128xf32>
    %c0_17 = arith.constant 0 : index
    %c0_18 = arith.constant 0 : index
    %25 = vector.load %arg7[%c0_17, %c0_18] : memref<1x128xf32, #tpu.memory_space<vmem>>, vector<1x128xf32>
    %26 = vector.broadcast %25 : vector<1x128xf32> to vector<16x128xf32>
    %27 = arith.addf %24, %26 : vector<16x128xf32>
    %28 = math.tanh %27 : vector<16x128xf32>
    %cst_19 = arith.constant 2.000000e+00 : f32
    %29 = vector.broadcast %cst_19 : f32 to vector<16x128xf32>
    %30 = arith.mulf %28, %29 : vector<16x128xf32>
    %c0_20 = arith.constant 0 : index
    %c0_21 = arith.constant 0 : index
    %31 = vector.load %arg8[%c0_20, %c0_21] : memref<16x128xf32, #tpu.memory_space<vmem>>, vector<16x128xf32>
    tpu.vector_store %arg8[%c0_20, %c0_21], %30 {strides = array<i32>} : memref<16x128xf32, #tpu.memory_space<vmem>>, vector<16x128xf32>,
    return
  }
  func.func @transform_0(%arg0: i32) -> (i32, i32) {
    %c0_i32 = arith.constant 0 : i32
    %c0_i32_0 = arith.constant 0 : i32
    return %arg0, %c0_i32 : i32, i32
  }
  func.func @transform_1(%arg0: i32) -> (i32, i32) {
    %c0_i32 = arith.constant 0 : i32
    %c0_i32_0 = arith.constant 0 : i32
    %c0_i32_1 = arith.constant 0 : i32
    return %c0_i32, %c0_i32_0 : i32, i32
  }
  func.func @transform_2(%arg0: i32) -> (i32, i32) {
    %c0_i32 = arith.constant 0 : i32
    %c0_i32_0 = arith.constant 0 : i32
    %c0_i32_1 = arith.constant 0 : i32
    return %c0_i32, %c0_i32_0 : i32, i32
  }
  func.func @transform_3(%arg0: i32) -> (i32, i32) {
    %c0_i32 = arith.constant 0 : i32
    %c0_i32_0 = arith.constant 0 : i32
    %c0_i32_1 = arith.constant 0 : i32
    return %c0_i32, %c0_i32_0 : i32, i32
  }
  func.func @transform_4(%arg0: i32) -> (i32, i32) {
    %c0_i32 = arith.constant 0 : i32
    %c0_i32_0 = arith.constant 0 : i32
    %c0_i32_1 = arith.constant 0 : i32
    return %c0_i32, %c0_i32_0 : i32, i32
  }
  func.func @transform_5(%arg0: i32) -> (i32, i32) {
    %c0_i32 = arith.constant 0 : i32
    %c0_i32_0 = arith.constant 0 : i32
    %c0_i32_1 = arith.constant 0 : i32
    return %c0_i32, %c0_i32_0 : i32, i32
  }
  func.func @transform_6(%arg0: i32) -> (i32, i32) {
    %c0_i32 = arith.constant 0 : i32
    %c0_i32_0 = arith.constant 0 : i32
    %c0_i32_1 = arith.constant 0 : i32
    return %c0_i32, %c0_i32_0 : i32, i32
  }
  func.func @transform_7(%arg0: i32) -> (i32, i32) {
    %c0_i32 = arith.constant 0 : i32
    %c0_i32_0 = arith.constant 0 : i32
    return %arg0, %c0_i32 : i32, i32
  }
}

</mosaic_0001>

<bundles_post_ra>
// kernel: tpu_custom_call.1
= control target key start
LH: loop header
LB: loop body
LE: loop exit
PB: predicated region body
PF: predicated region fallthrough
CT: control target
= control target key end

     0   :  { %12 = vsyncpa [#allocation3], 0  ;;  %s749_s0 = inlined_call_operand.hbm [shape: bf16[16,16], index: 0, kind: input, shape index: {}]   ;;  %s750_s1 = inlined_call_operand.hbm [shape: bf16[16,128], index: 1, kind: input, shape index: {}]   ;;  %s751_s2 = inlined_call_operand.vmem [shape: f32[1,128], index: 2, kind: input, shape index: {}]   ;;  %s752_s3 = inlined_call_operand.hbm [shape: bf16[128,128], index: 3, kind: input, shape index: {}]   ;;  %s753_s4 = inlined_call_operand.vmem [shape: f32[1,128], index: 4, kind: input, shape index: {}]   ;;  %s754_s5 = inlined_call_operand.hbm [shape: bf16[128,128], index: 5, kind: input, shape index: {}]   ;;  %s755_s6 = inlined_call_operand.vmem [shape: f32[1,128], index: 6, kind: input, shape index: {}]   ;;  %s756_s7 = inlined_call_operand.hbm [shape: f32[16,128], index: 7, kind: output, shape index: {}]  }
   0x1   :  { %13 = vsyncpa [#allocation6], 0 }
   0x2   :  { %14 = vsyncpa [#allocation9], 0 }
   0x3   :  { %15 = vsyncpa [#allocation4], 0  ;;  %s642_s24 = smov [#allocation5]   ;;  %s643_s26 = smov [#allocation2]  }
   0x4   :  { %s33_s25 = sshll.u32 %s642_s24, 4  ;;  %s21_s27 = sshll.u32 %s643_s26, 4  ;;  %s34_s25 = int_to_ptr.vmem [resolvable:$true] %s33_s25  ;;  %s22_s27 = int_to_ptr.vmem [resolvable:$true] %s21_s27 }
   0x5   :  { %s542_s28 = scalar_lea.vmem %s34_s25, 128  ;;  %p547_p1 = scmp.lt.s32.totalorder %s34_s25, %s34_s25 }
   0x6   :  { %p543_p0 = scmp.ne.s32.totalorder %s34_s25, %s542_s28  ;;  %p548_p2 = scmp.lt.s32.totalorder %s542_s28, %s542_s28 }
   0x8   :  { %p549_p3 = por %p548_p2, %p547_p1 }
   0xa   :  { %p550_p4 = pnand %p549_p3, %p543_p0 }
   0xc   :  { %553 = shalt.err (!%p550_p4)
}
   0xd   :  { %s644_s29 = smov 64   ;;  %s645_s30 = smov 4  }
   0xe   :  { %39 = dma.hbm_to_vmem [thread:$0]  %s750_s1, 128, %s34_s25, [#allocation6], %s644_s29, %s644_s29, %s645_s30  }
   0xf   :  { %s562_s10 = scalar_lea.vmem %s22_s27, 128  ;;  %p567_p6 = scmp.lt.s32.totalorder %s22_s27, %s22_s27 }
  0x10   :  { %p563_p5 = scmp.ne.s32.totalorder %s22_s27, %s562_s10  ;;  %p568_p7 = scmp.lt.s32.totalorder %s562_s10, %s562_s10 }
  0x12   :  { %p569_p8 = por %p568_p7, %p567_p6 }
  0x14   :  { %p570_p9 = pnand %p569_p8, %p563_p5 }
  0x16   :  { %573 = shalt.err (!%p570_p9)
}
  0x17   :  { %27 = dma.hbm_to_vmem [thread:$0]  %s749_s0, 128, %s22_s27, [#allocation3], %s644_s29, %s644_s29, %s645_s30  }
  0x18   :  { %s646_s13 = smov [#allocation7]   ;;  %s647_s15 = smov [#allocation8]  }
  0x19   :  { %s47_s14 = sshll.u32 %s646_s13, 4  ;;  %s61_s16 = sshll.u32 %s647_s15, 4  ;;  %s48_s14 = int_to_ptr.vmem [resolvable:$true] %s47_s14  ;;  %s62_s16 = int_to_ptr.vmem [resolvable:$true] %s61_s16 }
  0x1a   :  { %s582_s1 = scalar_lea.vmem %s48_s14, 1024  ;;  %p587_p11 = scmp.lt.s32.totalorder %s48_s14, %s48_s14 }
  0x1b   :  { %p583_p10 = scmp.ne.s32.totalorder %s48_s14, %s582_s1  ;;  %p588_p12 = scmp.lt.s32.totalorder %s582_s1, %s582_s1 }
  0x1d   :  { %p589_p13 = por %p588_p12, %p587_p11 }
  0x1f   :  { %p590_p0 = pnand %p589_p13, %p583_p10 }
  0x21   :  { %593 = shalt.err (!%p590_p0)
}
  0x22   :  { %53 = dma.hbm_to_vmem [thread:$0]  %s752_s3, 1024, %s48_s14, [#allocation6], %s644_s29, %s644_s29, %s645_s30  }
  0x23   :  { %s602_s0 = scalar_lea.vmem %s62_s16, 1024  ;;  %p607_p2 = scmp.lt.s32.totalorder %s62_s16, %s62_s16 }
  0x24   :  { %p603_p1 = scmp.ne.s32.totalorder %s62_s16, %s602_s0  ;;  %p608_p3 = scmp.lt.s32.totalorder %s602_s0, %s602_s0 }
  0x26   :  { %p609_p4 = por %p608_p3, %p607_p2 }
  0x28   :  { %p610_p5 = pnand %p609_p4, %p603_p1 }
  0x2a   :  { %613 = shalt.err (!%p610_p5)
}
  0x2b   :  { %67 = dma.hbm_to_vmem [thread:$0]  %s754_s5, 1024, %s62_s16, [#allocation9], %s644_s29, %s644_s29, %s645_s30  }
  0x2c   :  { %634 = dma.done.wait [#allocation3], 128  }
  0x2d   :  { %635 = vsyncadd [#allocation3], 4294967168 }
  0x2e   :  { %636 = dma.done.wait [#allocation6], 1152  }
  0x2f   :  { %637 = vsyncadd [#allocation6], 4294966144 }
  0x30   :  { %638 = dma.done.wait [#allocation9], 1024  }
  0x31   :  { %639 = vsyncadd [#allocation9], 4294966272  ;;  %v648_v0 = vmov 0.0   ;;  %vm649_vm0 = vmmov 0   ;;  %v512_v1 = vld [vmem:[#allocation5] sm:$0xff]   ;;  %v513_v2 = vld [vmem:[#allocation2] sm:$0xff]  }
  0x32   :  { %455 = vmatprep.subr.bf16.mxu0 %v648_v0  ;;  %457 = vmatprep.mubr.msk.bf16.mxu0 %vm649_vm0, %v648_v0  ;;  %vm105_vm1 = vcmask 130048   ;;  %v514_v3 = vld [vmem:[#allocation7 + $0x38] sm:$0xff]   ;;  %v515_v4 = vld [vmem:[#allocation7 + $0x30] sm:$0xff]   ;;  %v516_v5 = vld [vmem:[#allocation7 + $0x28] sm:$0xff]  }
  0x33   :  { %461 = vmatprep.subr.bf16.mxu1 %v648_v0  ;;  %477 = vmatprep.mubr.msk.bf16.mxu1 %vm649_vm0, %v648_v0  ;;  %v517_v6 = vld [vmem:[#allocation7 + $0x20] sm:$0xff]   ;;  %v518_v7 = vld [vmem:[#allocation7 + $0x18] sm:$0xff]   ;;  %v519_v8 = vld [vmem:[#allocation7 + $0x10] sm:$0xff]  }
  0x34   :  { %456 = vmatpush3.bf16.msra.mxu0 %v512_v1  ;;  %462 = vmatpush3.bf16.msra.mxu1 %v514_v3  ;;  %v520_v9 = vld [vmem:[#allocation7 + $0x8] sm:$0xff]   ;;  %v521_v10 = vld [vmem:[#allocation7] sm:$0xff]   ;;  %v522_v11 = vld [vmem:[#allocation8 + $0x38] sm:$0xff]  }
  0x35   :  { %481 = vmatprep.subr.bf16.mxu0 %v648_v0  ;;  %463 = vmatprep.subr.bf16.mxu1 %v648_v0  ;;  %v523_v12 = vld [vmem:[#allocation8 + $0x30] sm:$0xff]   ;;  %v524_v13 = vld [vmem:[#allocation8 + $0x28] sm:$0xff]   ;;  %v525_v14 = vld [vmem:[#allocation8 + $0x20] sm:$0xff]  }
  0x36   :  { %v526_v15 = vld [vmem:[#allocation8 + $0x18] sm:$0xff]   ;;  %v413_v16 = vld [vmem:[%s751_s2] ss:$0 sm:$0xff]  ;;  %v528_v29 = vld [vmem:[#allocation8 + $0x8] sm:$0xff]  }
  0x37   :  { %458 = vmatmul.mubr.msk.bf16.vlgmr.msra.gmra.mxu0 %vm105_vm1, %v513_v2  ;;  %v527_v28 = vld [vmem:[#allocation8 + $0x10] sm:$0xff]   ;;  %v529_v30 = vld [vmem:[#allocation8] sm:$0xff]  }
  0x38   :  { %497 = vmatprep.mubr.msk.bf16.mxu0 %vm649_vm0, %v648_v0  ;;  %464 = vmatpush3.bf16.msra.mxu1 %v515_v4  ;;  %v417_v31 = vld [vmem:[%s753_s4] ss:$0 sm:$0xff]  ;;  %s650_s4 = smov [#allocation10]  }
  0x39   :  { %465 = vmatprep.subr.bf16.mxu1 %v648_v0  ;;  %482 = vmatpush3.bf16.msra.mxu0 %v522_v11  ;;  %v426_v43 = vld [vmem:[%s755_s6] ss:$0 sm:$0xff]  ;;  %s399_s24 = sshll.u32 %s650_s4, 4  ;;  %s400_s24 = int_to_ptr.vmem [resolvable:$true] %s399_s24 }
  0x3a   :  { %483 = vmatprep.subr.bf16.mxu0 %v648_v0  ;;  %s614_s25 = scalar_lea.vmem %s400_s24, 256  ;;  %p619_p7 = scmp.lt.s32.totalorder %s400_s24, %s400_s24 }
  0x3b   :  { %p615_p6 = scmp.ne.s32.totalorder %s400_s24, %s614_s25  ;;  %p620_p8 = scmp.lt.s32.totalorder %s614_s25, %s614_s25 }
  0x3c   :  { %466 = vmatpush3.bf16.msra.mxu1 %v516_v5 }
  0x3d   :  { %467 = vmatprep.subr.bf16.mxu1 %v648_v0  ;;  %484 = vmatpush3.bf16.msra.mxu0 %v523_v12  ;;  %p621_p9 = por %p620_p8, %p619_p7 }
  0x3e   :  { %485 = vmatprep.subr.bf16.mxu0 %v648_v0 }
  0x3f   :  { %p622_p10 = pnand %p621_p9, %p615_p6 }
  0x40   :  { %468 = vmatpush3.bf16.msra.mxu1 %v517_v6 }
  0x41   :  { %469 = vmatprep.subr.bf16.mxu1 %v648_v0  ;;  %486 = vmatpush3.bf16.msra.mxu0 %v524_v13 }
  0x42   :  { %487 = vmatprep.subr.bf16.mxu0 %v648_v0 }
  0x44   :  { %470 = vmatpush3.bf16.msra.mxu1 %v518_v7 }
  0x45   :  { %471 = vmatprep.subr.bf16.mxu1 %v648_v0  ;;  %488 = vmatpush3.bf16.msra.mxu0 %v525_v14 }
  0x46   :  { %489 = vmatprep.subr.bf16.mxu0 %v648_v0 }
  0x48   :  { %472 = vmatpush3.bf16.msra.mxu1 %v519_v8 }
  0x49   :  { %473 = vmatprep.subr.bf16.mxu1 %v648_v0  ;;  %490 = vmatpush3.bf16.msra.mxu0 %v526_v15 }
  0x4a   :  { %491 = vmatprep.subr.bf16.mxu0 %v648_v0 }
  0x4c   :  { %474 = vmatpush3.bf16.msra.mxu1 %v520_v9 }
  0x4d   :  { %475 = vmatprep.subr.bf16.mxu1 %v648_v0  ;;  %492 = vmatpush3.bf16.msra.mxu0 %v527_v28 }
  0x4e   :  { %493 = vmatprep.subr.bf16.mxu0 %v648_v0 }
  0x50   :  { %476 = vmatpush3.bf16.msra.mxu1 %v521_v10 }
  0x51   :  { %494 = vmatpush3.bf16.msra.mxu0 %v528_v29 }
  0x52   :  { %495 = vmatprep.subr.bf16.mxu0 %v648_v0 }
  0x55   :  { %496 = vmatpush3.bf16.msra.mxu0 %v529_v30 }
  0xf7   :  { %v143_v17 = vpop.f32.mrf.mxu0 }
  0xf8   :  { %v144_v18 = vadd.f32 %v413_v16, %v143_v17 }
  0xf9   :  { %v459_v19 = vpop.f32.mrf.mxu0 }
  0xfa   :  { %v152_v21 = vmul.f32 0.01, %v144_v18  ;;  %vm150_vm2 = vcmp.gt.f32.partialorder %v144_v18, 0.0 }
  0xfb   :  { %v146_v20 = vpop.f32.mrf.mxu0 }
  0xfc   :  { %v147_v22 = vadd.f32 %v413_v16, %v146_v20  ;;  %v154_v25 = vsel %vm150_vm2, %v144_v18, %v152_v21 }
  0xfd   :  { %v460_v23 = vpop.f32.mrf.mxu0 }
  0xfe   :  { %vm151_vm3 = vcmp.gt.f32.partialorder %v147_v22, 0.0  ;;  %v153_v24 = vmul.f32 0.01, %v147_v22 }
 0x100   :  { %v155_v26 = vsel %vm151_vm3, %v147_v22, %v153_v24 }
 0x101   :  { %v156_v27 = vpack.c.bf16 %v155_v26, %v154_v25 }
 0x103   :  { %478 = vmatmul.mubr.bf16.vlgmr.msra.gmra.mxu1 %v156_v27 }
 0x1c3   :  { %v262_v32 = vpop.f32.mrf.mxu1 }
 0x1c4   :  { %v263_v33 = vadd.f32 %v417_v31, %v262_v32 }
 0x1c5   :  { %v479_v34 = vpop.f32.mrf.mxu1 }
 0x1c6   :  { %v271_v36 = vmul.f32 0.01, %v263_v33  ;;  %vm269_vm4 = vcmp.gt.f32.partialorder %v263_v33, 0.0 }
 0x1c7   :  { %v265_v35 = vpop.f32.mrf.mxu1 }
 0x1c8   :  { %v266_v37 = vadd.f32 %v417_v31, %v265_v35  ;;  %v273_v40 = vsel %vm269_vm4, %v263_v33, %v271_v36 }
 0x1c9   :  { %v480_v38 = vpop.f32.mrf.mxu1 }
 0x1ca   :  { %vm270_vm5 = vcmp.gt.f32.partialorder %v266_v37, 0.0  ;;  %v272_v39 = vmul.f32 0.01, %v266_v37 }
 0x1cc   :  { %v274_v41 = vsel %vm270_vm5, %v266_v37, %v272_v39 }
 0x1cd   :  { %v275_v42 = vpack.c.bf16 %v274_v41, %v273_v40 }
 0x1cf   :  { %498 = vmatmul.mubr.bf16.vlgmr.msra.gmra.mxu0 %v275_v42 }
 0x28f   :  { %v381_v44 = vpop.f32.mrf.mxu0 }
 0x290   :  { %v382_v45 = vadd.f32 %v426_v43, %v381_v44 }
 0x291   :  { %v499_v46 = vpop.f32.mrf.mxu0 }
 0x292   :  { %530 = vtanh.f32 %v382_v45 }
 0x293   :  { %v384_v47 = vpop.f32.mrf.mxu0 }
 0x294   :  { %v385_v48 = vadd.f32 %v426_v43, %v384_v47 }
 0x295   :  { %v500_v49 = vpop.f32.mrf.mxu0 }
 0x296   :  { %532 = vtanh.f32 %v385_v48 }
 0x29f   :  { %v531_v50 = vpop.eup %530 }
 0x2a0   :  { %v390_v51 = vmul.f32 2.0, %v531_v50 }
 0x2a2   :  { %392 = vst [vmem:[#allocation10] sm:$0xff] %v390_v51 }
 0x2a3   :  { %v533_v52 = vpop.eup %532 }
 0x2a4   :  { %v391_v53 = vmul.f32 2.0, %v533_v52 }
 0x2a6   :  { %393 = vst [vmem:[#allocation10 + $0x8] sm:$0xff] %v391_v53 }
 0x2a7   :  { %625 = shalt.err (!%p622_p10)
}
 0x2a8   :  { %s651_s6 = smov 128   ;;  %s652_s26 = smov 8  }
 0x2a9   :  { %405 = dma.vmem_to_hbm [thread:$0]  %s400_s24, 256, %s756_s7, [#allocation4], %s651_s6, %s651_s6, %s652_s26  }
 0x2aa   :  { %640 = dma.done.wait [#allocation4], 256  }
 0x2ab   :  { %641 = vsyncadd [#allocation4], 4294967040 }
 0x2ac   :  { %409 = vsyncpa [#allocation3], 1 }
 0x2ad   :  { %410 = vsyncpa [#allocation6], 1 }
 0x2ae   :  { %411 = vsyncpa [#allocation9], 1 }
 0x2af   :  { %412 = vsyncpa [#allocation4], 1 }

</bundles_post_ra>
